<compile_context>
chip_gen: v6e
topology: v6e:2x2x1
jax: 0.10.0
libtpu: 0.0.40
codegen_flags: <defaults>
</compile_context>

<pallas_src>
import functools

import jax
import jax.numpy as jnp
from jax.experimental import pallas as pl
from jax.experimental.pallas import tpu as pltpu


def _xw_kernel(x_ref, w_ref, o_ref, *, matmul_dtype):
    """out_tile = x_tile @ W_eff  (single MXU matmul, f32 accumulation)."""
    x = x_ref[...]                                   # (block_b, D)
    if x.dtype != matmul_dtype:
        x = x.astype(matmul_dtype)                   # in-kernel cast: no extra HBM bytes
    o_ref[...] = jnp.dot(
        x, w_ref[...], preferred_element_type=jnp.float32
    ).astype(o_ref.dtype)


_DEFAULT_BLOCK_B = 8192   # 8192 x 32 f32 = 1 MiB per x tile; safe on v5e/v6e/v7x


def _pick_block_b(B, cap=_DEFAULT_BLOCK_B):
    # Whole batch when it fits (block dim == full array dim is always legal);
    # otherwise a fixed 8-aligned tile + cdiv grid (Pallas pads the last block).
    return B if B <= cap else cap


def ortho_softround_forward(x, U, diag, *, matmul_dtype=None, block_b=None):
    """Forward pass of OrthogonalParameterWithSoftRounding.

    x:    (B, D) activations
    U:    (D, D) orthogonal weight (U_layer.weight)
    diag: (D,)   raw diagonal parameter
    matmul_dtype: optional MXU operand dtype (e.g. jnp.bfloat16); x is cast
                  inside the kernel, never copied in HBM. Accumulation is f32.
    """
    B, D = x.shape
    assert U.shape == (D, D) and diag.shape == (D,)
    out_dtype = x.dtype
    mm_dtype = x.dtype if matmul_dtype is None else matmul_dtype

    # --- tiny per-call precompute (plain XLA, done once, per perf review) ---
    d = jax.nn.sigmoid(diag.astype(jnp.float32))
    d = jax.nn.sigmoid(50.0 * (d - 0.5))
    d = jax.nn.sigmoid(50.0 * (d - 0.5))             # diag_rounded, (D,)
    Uf = U.astype(jnp.float32)
    W = (Uf * d[None, :]) @ Uf.T                     # U @ diag(d) @ U.T
    W_eff = W.T.astype(mm_dtype)                     # forward is x @ W.T (W symmetric)

    # --- Pallas kernel: stream x through a resident 32x32 weight ---
    if block_b is None:
        block_b = _pick_block_b(B)
    grid = (pl.cdiv(B, block_b),)

    kernel = functools.partial(_xw_kernel, matmul_dtype=mm_dtype)
    return pl.pallas_call(
        kernel,
        out_shape=jax.ShapeDtypeStruct((B, D), out_dtype),
        grid_spec=pltpu.PrefetchScalarGridSpec(
            num_scalar_prefetch=0,
            grid=grid,
            in_specs=[
                pl.BlockSpec((block_b, D), lambda i: (i, 0)),   # x: batch-tiled
                pl.BlockSpec((D, D), lambda i: (0, 0)),         # W_eff: resident
            ],
            out_specs=pl.BlockSpec((block_b, D), lambda i: (i, 0)),
        ),
        compiler_params=pltpu.CompilerParams(
            dimension_semantics=("parallel",)),
    )(x, W_eff)


def _reference_forward(x, U, diag):
    d = jax.nn.sigmoid(diag)
    d = jax.nn.sigmoid(50.0 * (d - 0.5))
    d = jax.nn.sigmoid(50.0 * (d - 0.5))
    W = U @ jnp.diag(d) @ U.T
    return x @ W.T


if __name__ == "__main__":
    D = 32   # module's feature dim
    B = 8    # small batch of row vectors

    key = jax.random.PRNGKey(0)
    kx, ku, kd, kx2 = jax.random.split(key, 4)

    # Deterministic orthogonal weight (stands in for nn.utils.parametrizations.orthogonal).
    raw = jax.random.normal(ku, (D, D), dtype=jnp.float32)
    U, _ = jnp.linalg.qr(raw)                                   # orthogonal DxD
    diag = jax.random.normal(kd, (D,), dtype=jnp.float32)       # nn.Parameter(torch.randn(D))
    x = jax.random.normal(kx, (B, D), dtype=jnp.float32)

    ref = _reference_forward(x, U, diag)

    # Default f32 path (single grid step at this size).
    out = jax.block_until_ready(ortho_softround_forward(x, U, diag))
    assert out.shape == (B, D) and out.dtype == x.dtype
    assert jnp.allclose(out, ref, atol=1e-4, rtol=1e-4)

    # Multi-step cdiv grid with a padded final block (exercises the tiling path).
    B2 = 20
    x2 = jax.random.normal(kx2, (B2, D), dtype=jnp.float32)
    out2 = jax.block_until_ready(ortho_softround_forward(x2, U, diag, block_b=8))
    assert out2.shape == (B2, D)
    assert jnp.allclose(out2, _reference_forward(x2, U, diag), atol=1e-4, rtol=1e-4)

    # bf16 MXU-operand path: x cast in-kernel, no bf16 copy of x in HBM.
    out_bf16 = jax.block_until_ready(
        ortho_softround_forward(x, U, diag, matmul_dtype=jnp.bfloat16))
    assert jnp.allclose(out_bf16, ref, atol=1e-1, rtol=5e-2)

    print("KERNEL_OK")
</pallas_src>

<mosaic_0001>
module attributes {stable_mosaic.version = 11 : i64} {
  func.func @_xw_kernel(%arg0: i32, %arg1: memref<8x32xf32, #tpu.memory_space<vmem>>, %arg2: memref<32x32xf32, #tpu.memory_space<vmem>>, %arg3: memref<8x32xf32, #tpu.memory_space<vmem>>) attributes {dimension_semantics = [#tpu.dimension_semantics<parallel>], iteration_bounds = array<i64: 1>, scalar_prefetch = 0 : i64, scratch_operands = 0 : i64, tpu.core_type = #tpu.core_type<tc>, window_params = [{transform_indices = @transform_0, window_bounds = array<i64: 8, 32>}, {pipeline_mode = #tpu.pipeline_mode<synchronous>, transform_indices = @transform_1, window_bounds = array<i64: 32, 32>}, {transform_indices = @transform_2, window_bounds = array<i64: 8, 32>}]} {
    %c0 = arith.constant 0 : index
    %c0_0 = arith.constant 0 : index
    %0 = vector.load %arg1[%c0, %c0_0] : memref<8x32xf32, #tpu.memory_space<vmem>>, vector<8x32xf32>
    %c0_1 = arith.constant 0 : index
    %c0_2 = arith.constant 0 : index
    %1 = vector.load %arg2[%c0_1, %c0_2] : memref<32x32xf32, #tpu.memory_space<vmem>>, vector<32x32xf32>
    %cst = arith.constant dense<0.000000e+00> : vector<8x32xf32>
    %2 = tpu.matmul %0, %1, %cst {dimension_numbers = #tpu.dot_dimension_numbers<[1], [0], [0], [1], [0, 0, 1, 1], [], []>} : vector<8x32xf32>, vector<32x32xf32>, vector<8x32xf32> -> vector<8x32xf32>
    %c0_3 = arith.constant 0 : index
    %c0_4 = arith.constant 0 : index
    %3 = vector.load %arg3[%c0_3, %c0_4] : memref<8x32xf32, #tpu.memory_space<vmem>>, vector<8x32xf32>
    tpu.vector_store %arg3[%c0_3, %c0_4], %2 {strides = array<i32>} : memref<8x32xf32, #tpu.memory_space<vmem>>, vector<8x32xf32>,
    return
  }
  func.func @transform_0(%arg0: i32) -> (i32, i32) {
    %c0_i32 = arith.constant 0 : i32
    %c0_i32_0 = arith.constant 0 : i32
    return %arg0, %c0_i32 : i32, i32
  }
  func.func @transform_1(%arg0: i32) -> (i32, i32) {
    %c0_i32 = arith.constant 0 : i32
    %c0_i32_0 = arith.constant 0 : i32
    %c0_i32_1 = arith.constant 0 : i32
    return %c0_i32, %c0_i32_0 : i32, i32
  }
  func.func @transform_2(%arg0: i32) -> (i32, i32) {
    %c0_i32 = arith.constant 0 : i32
    %c0_i32_0 = arith.constant 0 : i32
    return %arg0, %c0_i32 : i32, i32
  }
}

</mosaic_0001>

<bundles_post_ra>
// kernel: tpu_custom_call.1
= control target key start
LH: loop header
LB: loop body
LE: loop exit
PB: predicated region body
PF: predicated region fallthrough
CT: control target
= control target key end

     0   :  { %7 = vsyncpa [#allocation3], 0  ;;  %s255_s0 = inlined_call_operand.hbm [shape: f32[8,32], index: 0, kind: input, shape index: {}]   ;;  %s256_s1 = inlined_call_operand.hbm [shape: f32[32,32], index: 1, kind: input, shape index: {}]   ;;  %s257_s2 = inlined_call_operand.hbm [shape: f32[8,32], index: 2, kind: output, shape index: {}]  }
   0x1   :  { %8 = vsyncpa [#allocation6], 0 }
   0x2   :  { %9 = vsyncpa [#allocation4], 0  ;;  %s224_s9 = smov [#allocation2]   ;;  %s225_s11 = smov [#allocation5]  }
   0x3   :  { %s16_s10 = sshll.u32 %s224_s9, 4  ;;  %s25_s12 = sshll.u32 %s225_s11, 4  ;;  %s17_s10 = int_to_ptr.vmem [resolvable:$true] %s16_s10  ;;  %s26_s12 = int_to_ptr.vmem [resolvable:$true] %s25_s12 }
   0x4   :  { %s166_s13 = scalar_lea.vmem %s17_s10, 128  ;;  %p171_p1 = scmp.lt.s32.totalorder %s17_s10, %s17_s10 }
   0x5   :  { %p167_p0 = scmp.ne.s32.totalorder %s17_s10, %s166_s13  ;;  %p172_p2 = scmp.lt.s32.totalorder %s166_s13, %s166_s13 }
   0x7   :  { %p173_p3 = por %p172_p2, %p171_p1 }
   0x9   :  { %p174_p4 = pnand %p173_p3, %p167_p0 }
   0xb   :  { %177 = shalt.err (!%p174_p4)
}
   0xc   :  { %19 = dma.hbm_to_vmem [thread:$0]  %s255_s0, 128, %s17_s10, [#allocation3]  }
   0xd   :  { %s186_s16 = scalar_lea.vmem %s26_s12, 512  ;;  %p191_p6 = scmp.lt.s32.totalorder %s26_s12, %s26_s12 }
   0xe   :  { %p187_p5 = scmp.ne.s32.totalorder %s26_s12, %s186_s16  ;;  %p192_p7 = scmp.lt.s32.totalorder %s186_s16, %s186_s16 }
  0x10   :  { %p193_p8 = por %p192_p7, %p191_p6 }
  0x12   :  { %p194_p9 = pnand %p193_p8, %p187_p5 }
  0x14   :  { %197 = shalt.err (!%p194_p9)
}
  0x15   :  { %s226_s17 = smov 128   ;;  %s227_s18 = smov 8  }
  0x16   :  { %31 = dma.hbm_to_vmem [thread:$0]  %s256_s1, 512, %s26_s12, [#allocation6], %s226_s17, %s226_s17, %s227_s18  }
  0x17   :  { %218 = dma.done.wait [#allocation3], 128  }
  0x18   :  { %219 = vsyncadd [#allocation3], 4294967168 }
  0x19   :  { %220 = dma.done.wait [#allocation6], 512  }
  0x1a   :  { %221 = vsyncadd [#allocation6], 4294966784  ;;  %v228_v0 = vmov 0.0   ;;  %vm229_vm0 = vmmov 0   ;;  %v42_v1 = vld [vmem:[#allocation5 + $0x18] sm:$0xff]  ;;  %v41_v2 = vld [vmem:[#allocation5 + $0x10] sm:$0xff] }
  0x1b   :  { %140 = vmatprep.subr.mxu0 %v228_v0  ;;  %148 = vmatprep.mubr.msk.f32.mxu0 %vm229_vm0, %v228_v0  ;;  %v40_v3 = vld [vmem:[#allocation5 + $0x8] sm:$0xff]  ;;  %v39_v4 = vld [vmem:[#allocation5] sm:$0xff]  ;;  %v38_v5 = vld [vmem:[#allocation2] sm:$0xff]  ;;  %vm43_vm1 = vcmask 261120   ;;  %s230_s0 = smov [#allocation7]  }
  0x1c   :  { %141 = vmatpush3.msra.mxu0 %v42_v1  ;;  %s124_s1 = sshll.u32 %s230_s0, 4  ;;  %s125_s1 = int_to_ptr.vmem [resolvable:$true] %s124_s1 }
  0x1d   :  { %142 = vmatprep.subr.mxu0 %v228_v0  ;;  %s198_s21 = scalar_lea.vmem %s125_s1, 128  ;;  %p203_p11 = scmp.lt.s32.totalorder %s125_s1, %s125_s1 }
  0x1e   :  { %143 = vmatpush3.msra.mxu0 %v41_v2  ;;  %p199_p10 = scmp.ne.s32.totalorder %s125_s1, %s198_s21  ;;  %p204_p12 = scmp.lt.s32.totalorder %s198_s21, %s198_s21 }
  0x1f   :  { %144 = vmatprep.subr.mxu0 %v228_v0 }
  0x20   :  { %145 = vmatpush3.msra.mxu0 %v40_v3  ;;  %p205_p13 = por %p204_p12, %p203_p11 }
  0x21   :  { %146 = vmatprep.subr.mxu0 %v228_v0 }
  0x22   :  { %147 = vmatpush3.msra.mxu0 %v39_v4  ;;  %p206_p0 = pnand %p205_p13, %p199_p10 }
  0x23   :  { %149 = vmatmul.mubr.msk.f32.vlgmr.msra.gmra.mxu0 %vm43_vm1, %v38_v5 }
  0xe3   :  { %v113_v6 = vpop.f32.mrf.mxu0 }
  0xe4   :  { %117 = vst.msk [vmem:[#allocation7] sm:$0xff] %vm43_vm1, %v113_v6 }
  0xe5   :  { %v150_v7 = vpop.f32.mrf.mxu0 }
  0xe6   :  { %209 = shalt.err (!%p206_p0)
}
  0xe7   :  { %127 = dma.vmem_to_hbm [thread:$0]  %s125_s1, 128, %s257_s2, [#allocation4]  }
  0xe8   :  { %222 = dma.done.wait [#allocation4], 128  }
  0xe9   :  { %223 = vsyncadd [#allocation4], 4294967168 }
  0xea   :  { %131 = vsyncpa [#allocation3], 1 }
  0xeb   :  { %132 = vsyncpa [#allocation6], 1 }
  0xec   :  { %133 = vsyncpa [#allocation4], 1 }

</bundles_post_ra>
